<compile_context>
chip_gen: v5e
topology: v5e:2x2
jax: 0.10.0
libtpu: 0.0.40
codegen_flags: <defaults>
</compile_context>

<pallas_src>
import math
import functools

import jax
import jax.numpy as jnp
from jax import lax
from jax.experimental import pallas as pl
from jax.experimental.pallas import tpu as pltpu


def _attention_kernel(x_ref, wq_ref, wk_ref, wv_ref, wo_ref, bproj_ref,
                      o_ref, acc_ref, *, scale, compute_dtype, approx_recip):
    """One (batch, head) grid step: per-head attention + out-proj accumulation."""
    h = pl.program_id(1)

    @pl.when(h == 0)
    def _():
        acc_ref[...] = jnp.zeros_like(acc_ref)

    x = x_ref[...]                                                   # (N, C) compute_dtype

    # Per-head projections (MXU), f32 accumulation.
    q = jnp.dot(x, wq_ref[...], preferred_element_type=jnp.float32)  # (N, hd)
    k = jnp.dot(x, wk_ref[...], preferred_element_type=jnp.float32)  # (N, hd)
    v = jnp.dot(x, wv_ref[...], preferred_element_type=jnp.float32)  # (N, hd)
    q = q * scale                                                    # scale on q: N*hd mults

    # Scores: contract head_dim of q against head_dim of k -- no transpose through XLU.
    s = lax.dot_general(
        q.astype(compute_dtype), k.astype(compute_dtype),
        dimension_numbers=(((1,), (1,)), ((), ())),
        preferred_element_type=jnp.float32)                          # (N, N) f32

    # Numerically-stable softmax (f32); reciprocal on the EUP slot.
    s = s - jnp.max(s, axis=-1, keepdims=True)
    p = jnp.exp(s)
    denom = jnp.sum(p, axis=-1, keepdims=True)
    p = p * pl.reciprocal(denom, approx=approx_recip)
    # attn_drop is identity (p=0.0)

    o_h = jnp.dot(p.astype(compute_dtype), v.astype(compute_dtype),
                  preferred_element_type=jnp.float32)                # (N, hd)

    # Fold the output projection into the head loop (no lane-axis concat).
    acc_ref[...] += jnp.dot(o_h.astype(compute_dtype), wo_ref[...],
                            preferred_element_type=jnp.float32)      # (N, C)

    @pl.when(h == pl.num_programs(1) - 1)
    def _():
        # proj bias; proj_drop is identity (p=0.0)
        o_ref[...] = (acc_ref[...] + bproj_ref[...]).astype(o_ref.dtype)


def attention_pallas(x, w_qkv, w_proj, b_proj, *, num_heads,
                     use_bf16_matmul=False):
    B, N, C = x.shape
    H = num_heads
    assert C % H == 0, "dim must be divisible by num_heads"
    hd = C // H
    scale = hd ** (-0.5)
    out_dtype = x.dtype

    # ---- wrapper-side weight layout prep (keeps all lane slicing out of the kernel) ----
    # w_qkv is (C, 3C) with columns ordered [q(C), k(C), v(C)], heads contiguous inside each.
    w3 = w_qkv.reshape(C, 3, H, hd)
    wq = jnp.transpose(w3[:, 0], (1, 0, 2))        # (H, C, hd)
    wk = jnp.transpose(w3[:, 1], (1, 0, 2))        # (H, C, hd)
    wv = jnp.transpose(w3[:, 2], (1, 0, 2))        # (H, C, hd)
    wo = w_proj.reshape(H, hd, C)                  # (H, hd, C): per-head rows of W_proj
    b2 = b_proj.reshape(1, C).astype(jnp.float32)  # broadcast row

    compute_dtype = jnp.bfloat16 if use_bf16_matmul else x.dtype
    x_in = x.astype(compute_dtype)
    wq = wq.astype(compute_dtype)
    wk = wk.astype(compute_dtype)
    wv = wv.astype(compute_dtype)
    wo = wo.astype(compute_dtype)

    kernel = functools.partial(
        _attention_kernel, scale=scale,
        compute_dtype=compute_dtype, approx_recip=use_bf16_matmul)

    # Explicit VMEM budget (double-buffered blocks + f32 accumulator), floored/capped so
    # it is safe on v5e/v6e (128 MiB) and v7x (64 MiB).
    it = jnp.dtype(compute_dtype).itemsize
    blk_bytes = (N * C * it                        # x block
                 + 3 * C * hd * it                 # wq/wk/wv blocks
                 + hd * C * it                     # wo block
                 + C * 4                           # bias block
                 + N * C * jnp.dtype(out_dtype).itemsize)  # out block
    vmem_bytes = 2 * blk_bytes + N * C * 4         # pipeline double-buffers + acc scratch
    vmem_limit = min(max(3 * vmem_bytes, 16 * 1024 * 1024), 48 * 1024 * 1024)

    # Advisory cost estimate for XLA's scheduler.
    flops = (2 * B * N * C * 3 * C            # qkv projection
             + 4 * B * H * N * N * hd         # qk^T and attn@v
             + 2 * B * N * C * C)             # output projection
    bytes_accessed = (x.size + w_qkv.size + w_proj.size + b_proj.size) * 4 \
        + B * N * C * jnp.dtype(out_dtype).itemsize
    cost = pl.CostEstimate(flops=int(flops),
                           transcendentals=int(B * H * N * N),
                           bytes_accessed=int(bytes_accessed))

    return pl.pallas_call(
        kernel,
        out_shape=jax.ShapeDtypeStruct((B, N, C), out_dtype),
        grid_spec=pltpu.PrefetchScalarGridSpec(
            num_scalar_prefetch=0,
            grid=(B, H),
            in_specs=[
                # x: constant block index across the head axis -> stays resident in VMEM.
                pl.BlockSpec((pl.Squeezed(), N, C), lambda b, h: (b, 0, 0)),
                pl.BlockSpec((pl.Squeezed(), C, hd), lambda b, h: (h, 0, 0)),  # Wq[h]
                pl.BlockSpec((pl.Squeezed(), C, hd), lambda b, h: (h, 0, 0)),  # Wk[h]
                pl.BlockSpec((pl.Squeezed(), C, hd), lambda b, h: (h, 0, 0)),  # Wv[h]
                pl.BlockSpec((pl.Squeezed(), hd, C), lambda b, h: (h, 0, 0)),  # Wo[h]
                pl.BlockSpec((1, C), lambda b, h: (0, 0)),                     # proj bias
            ],
            out_specs=pl.BlockSpec((pl.Squeezed(), N, C), lambda b, h: (b, 0, 0)),
            scratch_shapes=[pltpu.VMEM((N, C), jnp.float32)],   # out-proj accumulator
        ),
        compiler_params=pltpu.CompilerParams(
            dimension_semantics=("parallel", "arbitrary"),
            vmem_limit_bytes=int(vmem_limit)),
        cost_estimate=cost,
    )(x_in, wq, wk, wv, wo, b2)


def attention_reference(x, w_qkv, w_proj, b_proj, *, num_heads):
    """Pure-JAX reference mirroring the PyTorch forward."""
    B, N, C = x.shape
    hd = C // num_heads
    scale = hd ** (-0.5)
    qkv = x @ w_qkv                                           # (B, N, 3C)
    qkv = qkv.reshape(B, N, 3, num_heads, hd).transpose(2, 0, 3, 1, 4)
    q, k, v = qkv[0], qkv[1], qkv[2]                          # (B, H, N, hd)
    attn = jnp.einsum("bhnd,bhmd->bhnm", q, k) * scale
    attn = jax.nn.softmax(attn, axis=-1)
    out = jnp.einsum("bhnm,bhmd->bhnd", attn, v)              # (B, H, N, hd)
    out = out.transpose(0, 2, 1, 3).reshape(B, N, C)
    return out @ w_proj + b_proj


def _make_params(key, C):
    k1, k2, k3 = jax.random.split(key, 3)
    lim = 1.0 / math.sqrt(C)
    w_qkv = jax.random.uniform(k1, (C, 3 * C), jnp.float32, -lim, lim)
    w_proj = jax.random.uniform(k2, (C, C), jnp.float32, -lim, lim)
    b_proj = jax.random.uniform(k3, (C,), jnp.float32, -lim, lim)
    return w_qkv, w_proj, b_proj


if __name__ == "__main__":
    key = jax.random.PRNGKey(0)

    # --- small shape consistent with the module: B=2, N=8, C=32, 8 heads ---
    B, N, C, H = 2, 8, 32, 8
    kx, kp = jax.random.split(key)
    x = jax.random.normal(kx, (B, N, C), dtype=jnp.float32)
    w_qkv, w_proj, b_proj = _make_params(kp, C)

    ref = attention_reference(x, w_qkv, w_proj, b_proj, num_heads=H)

    # f32 path (exact semantics of the PyTorch module)
    out = attention_pallas(x, w_qkv, w_proj, b_proj, num_heads=H)
    out = jax.block_until_ready(out)
    assert out.shape == (B, N, C)
    assert jnp.allclose(out, ref, atol=1e-5, rtol=1e-5), "f32 mismatch vs reference"

    # bf16-MXU path (v6e/v7x fast path): same structure, looser tolerance
    out_bf16 = attention_pallas(x, w_qkv, w_proj, b_proj, num_heads=H,
                                use_bf16_matmul=True)
    out_bf16 = jax.block_until_ready(out_bf16)
    assert jnp.allclose(out_bf16, ref, atol=3e-2, rtol=3e-2), "bf16 mismatch vs reference"

    # --- a second, slightly larger shape to exercise the (B, H) grid ---
    B2, N2, C2, H2 = 2, 128, 128, 8
    kx2, kp2 = jax.random.split(jax.random.PRNGKey(1))
    x2 = jax.random.normal(kx2, (B2, N2, C2), dtype=jnp.float32)
    w_qkv2, w_proj2, b_proj2 = _make_params(kp2, C2)
    ref2 = attention_reference(x2, w_qkv2, w_proj2, b_proj2, num_heads=H2)
    out2 = attention_pallas(x2, w_qkv2, w_proj2, b_proj2, num_heads=H2)
    out2 = jax.block_until_ready(out2)
    assert jnp.allclose(out2, ref2, atol=1e-4, rtol=1e-4), "f32 (large) mismatch vs reference"

    print("KERNEL_OK")
</pallas_src>

<mosaic_0001>
module attributes {stable_mosaic.version = 11 : i64} {
  func.func @_attention_kernel(%arg0: i32, %arg1: i32, %arg2: memref<1x8x32xf32, #tpu.memory_space<vmem>>, %arg3: memref<1x32x4xf32, #tpu.memory_space<vmem>>, %arg4: memref<1x32x4xf32, #tpu.memory_space<vmem>>, %arg5: memref<1x32x4xf32, #tpu.memory_space<vmem>>, %arg6: memref<1x4x32xf32, #tpu.memory_space<vmem>>, %arg7: memref<1x32xf32, #tpu.memory_space<vmem>>, %arg8: memref<1x8x32xf32, #tpu.memory_space<vmem>>, %arg9: memref<8x32xf32, #tpu.memory_space<vmem>>) attributes {dimension_semantics = [#tpu.dimension_semantics<parallel>, #tpu.dimension_semantics<arbitrary>], iteration_bounds = array<i64: 2, 8>, scalar_prefetch = 0 : i64, scratch_operands = 1 : i64, tpu.core_type = #tpu.core_type<tc>, window_params = [{transform_indices = @transform_0, window_bounds = array<i64: 1, 8, 32>}, {transform_indices = @transform_1, window_bounds = array<i64: 1, 32, 4>}, {transform_indices = @transform_2, window_bounds = array<i64: 1, 32, 4>}, {transform_indices = @transform_3, window_bounds = array<i64: 1, 32, 4>}, {transform_indices = @transform_4, window_bounds = array<i64: 1, 4, 32>}, {pipeline_mode = #tpu.pipeline_mode<synchronous>, transform_indices = @transform_5, window_bounds = array<i64: 1, 32>}, {transform_indices = @transform_6, window_bounds = array<i64: 1, 8, 32>}]} {
    %c0_i32 = arith.constant 0 : i32
    %0 = arith.cmpi eq, %arg1, %c0_i32 : i32
    %1 = arith.extui %0 : i1 to i32
    %c0_i32_0 = arith.constant 0 : i32
    %2 = arith.cmpi ne, %1, %c0_i32_0 : i32
    scf.if %2 {
      %cst_28 = arith.constant 0.000000e+00 : f32
      %37 = vector.broadcast %cst_28 : f32 to vector<8x32xf32>
      %c0_29 = arith.constant 0 : index
      %c0_30 = arith.constant 0 : index
      %38 = vector.load %arg9[%c0_29, %c0_30] : memref<8x32xf32, #tpu.memory_space<vmem>>, vector<8x32xf32>
      tpu.vector_store %arg9[%c0_29, %c0_30], %37 {strides = array<i32>} : memref<8x32xf32, #tpu.memory_space<vmem>>, vector<8x32xf32>,
    } else {
    }
    %c0 = arith.constant 0 : index
    %c0_1 = arith.constant 0 : index
    %c0_2 = arith.constant 0 : index
    %3 = vector.load %arg2[%c0, %c0_1, %c0_2] : memref<1x8x32xf32, #tpu.memory_space<vmem>>, vector<1x8x32xf32>
    %4 = vector.shape_cast %3 : vector<1x8x32xf32> to vector<8x32xf32>
    %c0_3 = arith.constant 0 : index
    %c0_4 = arith.constant 0 : index
    %c0_5 = arith.constant 0 : index
    %5 = vector.load %arg3[%c0_3, %c0_4, %c0_5] : memref<1x32x4xf32, #tpu.memory_space<vmem>>, vector<1x32x4xf32>
    %6 = vector.shape_cast %5 : vector<1x32x4xf32> to vector<32x4xf32>
    %cst = arith.constant dense<0.000000e+00> : vector<8x4xf32>
    %7 = tpu.matmul %4, %6, %cst {dimension_numbers = #tpu.dot_dimension_numbers<[1], [0], [0], [1], [0, 0, 1, 1], [], []>} : vector<8x32xf32>, vector<32x4xf32>, vector<8x4xf32> -> vector<8x4xf32>
    %c0_6 = arith.constant 0 : index
    %c0_7 = arith.constant 0 : index
    %c0_8 = arith.constant 0 : index
    %8 = vector.load %arg4[%c0_6, %c0_7, %c0_8] : memref<1x32x4xf32, #tpu.memory_space<vmem>>, vector<1x32x4xf32>
    %9 = vector.shape_cast %8 : vector<1x32x4xf32> to vector<32x4xf32>
    %cst_9 = arith.constant dense<0.000000e+00> : vector<8x4xf32>
    %10 = tpu.matmul %4, %9, %cst_9 {dimension_numbers = #tpu.dot_dimension_numbers<[1], [0], [0], [1], [0, 0, 1, 1], [], []>} : vector<8x32xf32>, vector<32x4xf32>, vector<8x4xf32> -> vector<8x4xf32>
    %c0_10 = arith.constant 0 : index
    %c0_11 = arith.constant 0 : index
    %c0_12 = arith.constant 0 : index
    %11 = vector.load %arg5[%c0_10, %c0_11, %c0_12] : memref<1x32x4xf32, #tpu.memory_space<vmem>>, vector<1x32x4xf32>
    %12 = vector.shape_cast %11 : vector<1x32x4xf32> to vector<32x4xf32>
    %cst_13 = arith.constant dense<0.000000e+00> : vector<8x4xf32>
    %13 = tpu.matmul %4, %12, %cst_13 {dimension_numbers = #tpu.dot_dimension_numbers<[1], [0], [0], [1], [0, 0, 1, 1], [], []>} : vector<8x32xf32>, vector<32x4xf32>, vector<8x4xf32> -> vector<8x4xf32>
    %cst_14 = arith.constant 5.000000e-01 : f32
    %14 = vector.broadcast %cst_14 : f32 to vector<8x4xf32>
    %15 = arith.mulf %7, %14 : vector<8x4xf32>
    %cst_15 = arith.constant dense<0.000000e+00> : vector<8x8xf32>
    %16 = tpu.matmul %15, %10, %cst_15 {dimension_numbers = #tpu.dot_dimension_numbers<[1], [1], [0], [0], [0, 0, 1, 0], [], []>} : vector<8x4xf32>, vector<8x4xf32>, vector<8x8xf32> -> vector<8x8xf32>
    %cst_16 = arith.constant dense<0xFF800000> : vector<8xf32>
    %17 = vector.multi_reduction <maximumf>, %16, %cst_16 [1] : vector<8x8xf32> to vector<8xf32>
    %18 = vector.shape_cast %17 : vector<8xf32> to vector<8x1xf32>
    %19 = vector.broadcast %18 : vector<8x1xf32> to vector<8x8xf32>
    %20 = arith.subf %16, %19 : vector<8x8xf32>
    %21 = math.exp %20 : vector<8x8xf32>
    %cst_17 = arith.constant dense<0.000000e+00> : vector<8xf32>
    %22 = vector.multi_reduction <add>, %21, %cst_17 [1] : vector<8x8xf32> to vector<8xf32>
    %23 = vector.shape_cast %22 : vector<8xf32> to vector<8x1xf32>
    %24 = tpu.reciprocal %23 : vector<8x1xf32> -> vector<8x1xf32>
    %25 = vector.broadcast %24 : vector<8x1xf32> to vector<8x8xf32>
    %26 = arith.mulf %21, %25 : vector<8x8xf32>
    %cst_18 = arith.constant dense<0.000000e+00> : vector<8x4xf32>
    %27 = tpu.matmul %26, %13, %cst_18 {dimension_numbers = #tpu.dot_dimension_numbers<[1], [0], [0], [1], [0, 0, 1, 1], [], []>} : vector<8x8xf32>, vector<8x4xf32>, vector<8x4xf32> -> vector<8x4xf32>
    %c0_19 = arith.constant 0 : index
    %c0_20 = arith.constant 0 : index
    %28 = vector.load %arg9[%c0_19, %c0_20] : memref<8x32xf32, #tpu.memory_space<vmem>>, vector<8x32xf32>
    %c0_21 = arith.constant 0 : index
    %c0_22 = arith.constant 0 : index
    %c0_23 = arith.constant 0 : index
    %29 = vector.load %arg6[%c0_21, %c0_22, %c0_23] : memref<1x4x32xf32, #tpu.memory_space<vmem>>, vector<1x4x32xf32>
    %30 = vector.shape_cast %29 : vector<1x4x32xf32> to vector<4x32xf32>
    %cst_24 = arith.constant dense<0.000000e+00> : vector<8x32xf32>
    %31 = tpu.matmul %27, %30, %cst_24 {dimension_numbers = #tpu.dot_dimension_numbers<[1], [0], [0], [1], [0, 0, 1, 1], [], []>} : vector<8x4xf32>, vector<4x32xf32>, vector<8x32xf32> -> vector<8x32xf32>
    %32 = arith.addf %28, %31 : vector<8x32xf32>
    %c0_25 = arith.constant 0 : index
    %c0_26 = arith.constant 0 : index
    %33 = vector.load %arg9[%c0_25, %c0_26] : memref<8x32xf32, #tpu.memory_space<vmem>>, vector<8x32xf32>
    tpu.vector_store %arg9[%c0_25, %c0_26], %32 {strides = array<i32>} : memref<8x32xf32, #tpu.memory_space<vmem>>, vector<8x32xf32>,
    %c7_i32 = arith.constant 7 : i32
    %34 = arith.cmpi eq, %arg1, %c7_i32 : i32
    %35 = arith.extui %34 : i1 to i32
    %c0_i32_27 = arith.constant 0 : i32
    %36 = arith.cmpi ne, %35, %c0_i32_27 : i32
    scf.if %36 {
      %c0_28 = arith.constant 0 : index
      %c0_29 = arith.constant 0 : index
      %37 = vector.load %arg9[%c0_28, %c0_29] : memref<8x32xf32, #tpu.memory_space<vmem>>, vector<8x32xf32>
      %c0_30 = arith.constant 0 : index
      %c0_31 = arith.constant 0 : index
      %38 = vector.load %arg7[%c0_30, %c0_31] : memref<1x32xf32, #tpu.memory_space<vmem>>, vector<1x32xf32>
      %39 = vector.broadcast %38 : vector<1x32xf32> to vector<8x32xf32>
      %40 = arith.addf %37, %39 : vector<8x32xf32>
      %c0_32 = arith.constant 0 : index
      %c0_33 = arith.constant 0 : index
      %c0_34 = arith.constant 0 : index
      %41 = vector.load %arg8[%c0_32, %c0_33, %c0_34] : memref<1x8x32xf32, #tpu.memory_space<vmem>>, vector<1x8x32xf32>
      %42 = vector.shape_cast %41 : vector<1x8x32xf32> to vector<8x32xf32>
      %43 = vector.shape_cast %40 : vector<8x32xf32> to vector<1x8x32xf32>
      tpu.vector_store %arg8[%c0_32, %c0_33, %c0_34], %43 {strides = array<i32>} : memref<1x8x32xf32, #tpu.memory_space<vmem>>, vector<1x8x32xf32>,
    } else {
    }
    return
  }
  func.func @transform_0(%arg0: i32, %arg1: i32) -> (i32, i32, i32) {
    %c0_i32 = arith.constant 0 : i32
    %c0_i32_0 = arith.constant 0 : i32
    %c0_i32_1 = arith.constant 0 : i32
    return %arg0, %c0_i32, %c0_i32_0 : i32, i32, i32
  }
  func.func @transform_1(%arg0: i32, %arg1: i32) -> (i32, i32, i32) {
    %c0_i32 = arith.constant 0 : i32
    %c0_i32_0 = arith.constant 0 : i32
    %c0_i32_1 = arith.constant 0 : i32
    return %arg1, %c0_i32, %c0_i32_0 : i32, i32, i32
  }
  func.func @transform_2(%arg0: i32, %arg1: i32) -> (i32, i32, i32) {
    %c0_i32 = arith.constant 0 : i32
    %c0_i32_0 = arith.constant 0 : i32
    %c0_i32_1 = arith.constant 0 : i32
    return %arg1, %c0_i32, %c0_i32_0 : i32, i32, i32
  }
  func.func @transform_3(%arg0: i32, %arg1: i32) -> (i32, i32, i32) {
    %c0_i32 = arith.constant 0 : i32
    %c0_i32_0 = arith.constant 0 : i32
    %c0_i32_1 = arith.constant 0 : i32
    return %arg1, %c0_i32, %c0_i32_0 : i32, i32, i32
  }
  func.func @transform_4(%arg0: i32, %arg1: i32) -> (i32, i32, i32) {
    %c0_i32 = arith.constant 0 : i32
    %c0_i32_0 = arith.constant 0 : i32
    %c0_i32_1 = arith.constant 0 : i32
    return %arg1, %c0_i32, %c0_i32_0 : i32, i32, i32
  }
  func.func @transform_5(%arg0: i32, %arg1: i32) -> (i32, i32) {
    %c0_i32 = arith.constant 0 : i32
    %c0_i32_0 = arith.constant 0 : i32
    %c0_i32_1 = arith.constant 0 : i32
    return %c0_i32, %c0_i32_0 : i32, i32
  }
  func.func @transform_6(%arg0: i32, %arg1: i32) -> (i32, i32, i32) {
    %c0_i32 = arith.constant 0 : i32
    %c0_i32_0 = arith.constant 0 : i32
    %c0_i32_1 = arith.constant 0 : i32
    return %arg0, %c0_i32, %c0_i32_0 : i32, i32, i32
  }
}

</mosaic_0001>

<bundles_post_ra>
// kernel: tpu_custom_call.1
= control target key start
LH: loop header
LB: loop body
LE: loop exit
PB: predicated region body
PF: predicated region fallthrough
CT: control target
= control target key end

     0   :  { %11 = vsyncpa [#allocation4], 0  ;;  %s1078_s0 = inlined_call_operand.vmem [shape: f32[2,8,32], index: 0, kind: input, shape index: {}]   ;;  %s1079_s1 = inlined_call_operand.vmem [shape: f32[8,32,4], index: 1, kind: input, shape index: {}]   ;;  %s1080_s2 = inlined_call_operand.vmem [shape: f32[8,32,4], index: 2, kind: input, shape index: {}]   ;;  %s1081_s3 = inlined_call_operand.vmem [shape: f32[8,32,4], index: 3, kind: input, shape index: {}]   ;;  %s1082_s4 = inlined_call_operand.vmem [shape: f32[8,4,32], index: 4, kind: input, shape index: {}]   ;;  %s1083_s5 = inlined_call_operand.vmem [shape: f32[1,32], index: 5, kind: input, shape index: {}]   ;;  %s1084_s6 = inlined_call_operand.hbm [shape: f32[2,8,32], index: 6, kind: output, shape index: {}]  }
   0x1   :  { %13 = vsyncpa [#allocation4 + $0x1], 0  ;;  %s911_s21 = smov 0   ;;  %s913_s22 = smov 0  }
   0x2   :  { %s915_s23 = smov 0   ;;  %s917_s24 = smov 0  }
   0x3   :  { %s919_s25 = smov 0   ;;  %s921_s26 = smov 0  }
   0x4   :  { %s923_s27 = smov 0   ;;  %s925_s28 = smov 0  }
   0x5 LB: > { %1092 = sst [smem:[#allocation6_spill]] %s845_s21  ;;  %s671_s29 = sadd.s32 4294967295, %s873_s28   ;;  %s873_s28 = sphi %s925_s28, %s19_s28   ;;  %s869_s27 = sphi %s923_s27, %s1110_s27   ;;  %s865_s26 = sphi %s921_s26, %s1114_s26   ;;  %s861_s25 = sphi %s919_s25, %s1108_s25   ;;  %s857_s24 = sphi %s917_s24, %s1107_s24   ;;  %s853_s23 = sphi %s915_s23, %s1113_s23   ;;  %s849_s22 = sphi %s913_s22, %s1112_s22   ;;  %s845_s21 = sphi %s911_s21, %s1111_s21  }
   0x6   : > { %1093 = sst [smem:[#allocation7_spill]] %s853_s23  ;;  %s672_s30 = sadd.s32 4294967294, %s873_s28  }
   0x7   : > { %1094 = sst [smem:[#allocation8_spill]] %s865_s26  ;;  %s28_s7 = sadd.s32 1, %s865_s26 }
   0x8   : > { %1095 = sst [smem:[#allocation9_spill]] %s869_s27  ;;  %p29_p0 = scmp.ge.s32.totalorder %s28_s7, 8 }
   0x9   : > { %s31_s8 = sadd.s32 1, %s869_s27  ;;  %p199_p1 = scmp.ne.s32.totalorder %s853_s23, %s849_s22 }
   0xa   : > { %p200_p2 = scmp.eq.s32.totalorder %s671_s29, 15  ;;  %s1116_s7 = smov (%p29_p0, %s28_s7), 0 }
   0xb   : > { %1096 = sst [smem:[#allocation10_spill]] %s1116_s7  ;;  %s1118_s8 = smov (!%p29_p0, %s31_s8), %s869_s27 }
   0xc   : > { %p960_p3 = por %p200_p2, %p199_p1  ;;  %p205_p4 = scmp.ne.s32.totalorder %s849_s22, %s845_s21 }
   0xd   : > { %p33_p5 = scmp.ge.s32.totalorder %s1118_s8, 2  ;;  %p206_p6 = scmp.eq.s32.totalorder %s672_s30, 15 }
   0xe   : > { %p675_p7 = scmp.ge.s32.totalorder %s873_s28, 1  ;;  %p265_p8 = scmp.lt.s32.totalorder %s873_s28, 17 }
   0xf   : > { %s1120_s8 = smov (%p33_p5, %s1118_s8), 0  ;;  %p970_p9 = por %p206_p6, %p205_p4 }
  0x10   : > { %1098 = sst [smem:[#allocation11_spill]] %s1120_s8  ;;  %p266_p10 = pnand %p675_p7, %p265_p8 }
  0x11   : > { %s1099_s10 = scalar_select %p970_p9, 1, 0 }
  0x12   : > { %s186_s11 = ssub.s32 %s869_s27, %s1120_s8  ;;  %s189_s12 = sadd.s32 1, %s853_s23 }
  0x13   : > { %1100 = sst [smem:[#allocation12_spill]] %s1099_s10  ;;  %p187_p11 = scmp.eq.s32.totalorder %s186_s11, 0 }
  0x14   : > { %269 = sbr.rel (%p266_p10) target bundleno = 853 (0x355), region = 44  ;;  %s1088_s14 = sand.u32 (!%p266_p10), 1, %s849_s22  }
  0x15   : > { %s978_s13 = scalar_select %p187_p11, %s853_s23, %s189_s12  }
  0x16   : > { %p313_p12 = scmp.lt.s32.totalorder (!%p266_p10), %s861_s25, 1  ;;  %s984_s15 = sshll.u32 (!%p266_p10), %s1088_s14, 3 }
  0x17   : > { %1101 = sst [smem:[#allocation13_spill]] %s978_s13  ;;  %p317_p13 = scmp.lt.s32.totalorder (!%p266_p10), %s857_s24, 7 }
  0x18   : > { %p685_p0 = scmp.ne.s32.totalorder (!%p266_p10), %s857_s24, 0 }
  0x19   : > { %s314_s16 = scalar_select %p313_p12, %s861_s25, 1 }
  0x1a   : > { %s318_s17 = scalar_select %p317_p13, %s857_s24, 7 }
  0x1b   : > { %s677_s18 = sshll.u32 %s314_s16, 3  ;;  %339 = sbr.rel (%p685_p0) target bundleno = 34 (0x22), region = 48 }
  0x1c   : > { %s316_s29 = scalar_lea.vmem %s1078_s0, %s677_s18  ;;  %s699_s30 = sshll.u32 %s318_s17, 5 }
  0x1d   : > { %s321_s8 = scalar_lea.vmem %s1079_s1, %s699_s30  ;;  %s326_s26 = scalar_lea.vmem %s1080_s2, %s699_s30 }
  0x1e   : > { %s1001_s23 = scalar_lea.vmem %s1081_s3, %s699_s30  ;;  %s684_s10 = sshll.u32 %s318_s17, 2 }
  0x1f   : > { %s1006_s19 = scalar_lea.vmem %s1082_s4, %s684_s10  ;;  %s312_s18 = scalar_lea.vmem [#allocation3], %s984_s15 }
  0x20   : > { %vm340_vm0 = vcmask 261120   ;;  %v875_v0 = vmov 0.0  }
  0x21   : > { %341 = vst.msk [vmem:[#allocation2] sm:$0xff] %vm340_vm0, %v875_v0 }
  0x22 PF: > { %v374_v1 = vld [vmem:[%s326_s26 + $0x18] sm:$0xff]  ;;  %v373_v3 = vld [vmem:[%s326_s26 + $0x10] sm:$0xff]  ;;  %v372_v5 = vld [vmem:[%s326_s26 + $0x8] sm:$0xff]  ;;  %vm347_vm1 = vcmask 261120   ;;  %vm420_vm2 = vcmask 31744   ;;  %vm447_vm3 = vcmask 64512  }
  0x23   : > { %v346_v2 = vld [vmem:[%s321_s8 + $0x18] sm:$0xff]  ;;  %387 = vmatpush.msra.mxu1 %v374_v1  ;;  %v345_v4 = vld [vmem:[%s321_s8 + $0x10] sm:$0xff]  ;;  %v344_v6 = vld [vmem:[%s321_s8 + $0x8] sm:$0xff]  ;;  %vm500_vm4 = vcmask 1043456   ;;  %p694_p1 = scmp.ne.s32.totalorder %s857_s24, 7 }
  0x24   : > { %363 = vmatpush.msra.mxu0 %v346_v2  ;;  %v371_v7 = vld [vmem:[%s326_s26] sm:$0xff]  ;;  %v398_v15 = vld [vmem:[%s1001_s23 + $0x18] sm:$0xff]  ;;  %v397_v16 = vld [vmem:[%s1001_s23 + $0x10] sm:$0xff] }
  0x25   : > { %388 = vmatpush.msra.mxu1 %v373_v3  ;;  %v343_v8 = vld [vmem:[%s321_s8] sm:$0xff]  ;;  %411 = vmatpush.msra.mxu2 %v398_v15  ;;  %v396_v17 = vld [vmem:[%s1001_s23 + $0x8] sm:$0xff] }
  0x26   : > { %364 = vmatpush.msra.mxu0 %v345_v4  ;;  %v342_v9 = vld [vmem:[%s316_s29] sm:$0xff] }
  0x27   : > { %389 = vmatpush.msra.mxu1 %v372_v5  ;;  %412 = vmatpush.msra.mxu2 %v397_v16  ;;  %v395_v18 = vld [vmem:[%s1001_s23] sm:$0xff] }
  0x28   : > { %365 = vmatpush.msra.mxu0 %v344_v6  ;;  %v496_v25 = vld [vmem:[%s1006_s19] sm:$0xf] }
  0x29   : > { %390 = vmatpush.msra.mxu1 %v371_v7  ;;  %413 = vmatpush.msra.mxu2 %v396_v17  ;;  %v495_v39 = vld [vmem:[#allocation2] sm:$0xff] }
  0x2a   : > { %366 = vmatpush.msra.mxu0 %v343_v8  ;;  %687 = vmatmul.msk.f32.vlgmr.msra.gmra.mxu1 %vm347_vm1, %v342_v9 }
  0x2b   : > { %686 = vmatmul.msk.f32.vlgmr.msra.gmra.mxu0 %vm347_vm1, %v342_v9  ;;  %414 = vmatpush.msra.mxu2 %v395_v18 }
  0x2c   : > { %688 = vmatmul.msk.f32.vlgmr.msra.gmra.mxu2 %vm347_vm1, %v342_v9  ;;  %692 = vmatpush.msk.msrb.mxu0 %vm500_vm4, %v496_v25 }
  0xa7   : > { %v392_v10 = vpop.f32.mrf.mxu1 }
  0xa8   : > { %v368_v11 = vpop.f32.mrf.mxu0  ;;  %689 = vmatpush.xpose.msk.msra.mxu3 %vm420_vm2, %v392_v10 }
  0xa9   : > { %v419_v12 = vmul.f32 0.5, %v368_v11 }
  0xab   : > { %690 = vmatmul.msk.f32.vlgmr.msra.gmra.mxu3 %vm420_vm2, %v419_v12 }
  0xaf   : > { %v416_v24 = vpop.f32.mrf.mxu2 }
  0xb0   : > { %490 = vmatpush.msrb.mxu3 %v416_v24 }
 0x12e   : > { %v444_v13 = vpop.f32.mrf.mxu3 }
 0x12f   : > { %v448_v14 = vsel %vm447_vm3, %v444_v13, -inf }
 0x130   : > { %449 = vmax.xlane.f32.xlu0 %v448_v14 }
 0x1a3   : > { %v450_v19 = vpop.xlane.xlu0 %449 }
 0x1a4   : > { %v451_v20 = vsub.f32 %v444_v13, %v450_v19 }
 0x1a6   : > { %v452_v21 = vmul.f32 1.442695, %v451_v20 }
 0x1a8   : > { %774 = vpow2.f32 %v452_v21 }
 0x1ae   : > { %v775_v22 = vpop.eup %774 }
 0x1af   : > { %v454_v23 = vsel %vm447_vm3, %v775_v22, 0.0 }
 0x1b0   : > { %455 = vadd.xlane.f32.xlu0 %v454_v23 }
 0x223   : > { %v456_v26 = vpop.xlane.xlu0 %455 }
 0x224   : > { %776 = vrcp.f32 %v456_v26  ;;  %v468_v30 = vand.u32 2147483648, %v456_v26  ;;  %v466_v32 = vand.u32 2147483647, %v456_v26  ;;  %vm462_vm6 = vweird.f32 %v456_v26 }
 0x226   : > { %v469_v34 = vor.u32 1.1754944e-38, %v468_v30  ;;  %vm467_vm8 = vcmp.eq.f32.partialorder %v466_v32, 8.507059e+37 }
 0x22a   : > { %v777_v27 = vpop.eup %776 }
 0x22b   : > { %v458_v28 = vmul.f32 %v777_v27, %v456_v26  ;;  %vm463_vm5 = vweird.f32 %v777_v27 }
 0x22c   : > { %vm464_vm7 = vmor %vm462_vm6, %vm463_vm5 }
 0x22d   : > { %v459_v29 = vsub.f32 1.0, %v458_v28 }
 0x22f   : > { %v460_v31 = vmul.f32 %v777_v27, %v459_v29 }
 0x231   : > { %v461_v33 = vadd.f32 %v777_v27, %v460_v31 }
 0x233   : > { %v465_v35 = vsel %vm464_vm7, %v777_v27, %v461_v33 }
 0x234   : > { %v470_v36 = vsel %vm467_vm8, %v469_v34, %v465_v35 }
 0x235   : > { %v471_v37 = vmul.f32 %v775_v22, %v470_v36 }
 0x237   : > { %691 = vmatmul.msk.f32.vlgmr.msrb.gmra.mxu3 %vm447_vm3, %v471_v37 }
 0x2ba   : > { %v492_v38 = vpop.f32.mrf.mxu3 }
 0x2bb   : > { %693 = vmatmul.msk.f32.vlgmr.msrb.gmra.mxu0 %vm420_vm2, %v492_v38 }
 0x337   : > { %529 = sbr.rel (%p694_p1) target bundleno = 838 (0x346), region = 52 }
 0x338   : > { %v521_v40 = vpop.f32.mrf.mxu0 }
 0x339   : > { %v524_v41 = vadd.f32 %v521_v40, %v495_v39 }
 0x33b   : > { %525 = vst.msk [vmem:[#allocation2] sm:$0xff] %vm347_vm1, %v524_v41 }
 0x33c   : > { %v778_v43 = vld [vmem:[%s1083_s5] ss:$0 sm:$0xff] }
 0x342   : > { %v530_v42 = vld [vmem:[#allocation2] sm:$0xff] }
 0x343   : > { %v535_v44 = vadd.f32 %v778_v43, %v530_v42 }
 0x345   : > { %536 = vst.msk [vmem:[%s312_s18] sm:$0xff] %vm347_vm1, %v535_v44 }
 0x346 PF: > { %s696_s26 = sshll.u32 %s861_s25, 3  ;;  %s550_s8 = sshll.u32 %s312_s18, 4  ;;  %s551_s8 = int_to_ptr.vmem [resolvable:$true] %s550_s8 }
 0x347   : > { %s548_s24 = scalar_lea.hbm %s1084_s6, %s696_s26  ;;  %s1102_s13 = sand.u32 1, %s849_s22  }
 0x348   : > { %s552_s10 = sshll.u32 %s548_s24, 4  ;;  %s538_s14 = scalar_lea.sflag [#allocation4], %s1102_s13  ;;  %s553_s10 = int_to_ptr.hbm [resolvable:$true] %s552_s10 }
 0x349   : > { %s793_s17 = sshra.s32 %s553_s10, 4  ;;  %s799_s30 = scalar_lea.hbm %s1084_s6, 16  ;;  %s794_s17 = int_to_ptr.hbm [resolvable:$true] %s793_s17 }
 0x34a   : > { %s795_s20 = scalar_lea.hbm %s794_s17, 8  ;;  %p800_p6 = scmp.lt.s32.totalorder %s794_s17, %s1084_s6 }
 0x34b   : > { %p796_p2 = scmp.ne.s32.totalorder %s794_s17, %s795_s20  ;;  %p801_p7 = scmp.lt.s32.totalorder %s799_s30, %s795_s20 }
 0x34d   : > { %p797_p4 = pnand %p796_p2, %p960_p3  ;;  %p802_p8 = por %p801_p7, %p800_p6 }
 0x34f   : > { %p798_p5 = pneg %p797_p4 }
 0x351   : > { %p803_p10 = pnand %p802_p8, %p798_p5 }
 0x353   : > { %806 = shalt.err (!%p803_p10)
}
 0x354   : > { %702 = dma.vmem_to_hbm [thread:$0]  (%p960_p3), %s551_s8, 128, %s553_s10, %s538_s14  }
 0x355 PF: > { %s1103_s15 = sld [smem:[#allocation6_spill]]  ;;  %p708_p11 = scmp.ge.s32.totalorder %s873_s28, 2 }
 0x357   : > { %p705_p12 = pnand %p708_p11, %p970_p9 }
 0x359   : > { %p706_p13 = pneg %p705_p12 }
 0x35b   : > { %s564_s19 = sand.u32 1, %s1103_s15  }
 0x35c   : > { %s565_s18 = scalar_lea.sflag [#allocation4], %s564_s19 }
 0x35d   : > { %840 = dma.done.wait (%p706_p13), %s565_s18, 128  }
 0x35e   : > { %842 = vsyncadd (%p706_p13), %s565_s18, 4294967168  ;;  %s19_s28 = sadd.s32 1, %s873_s28   ;;  %s1105_s23 = sld [smem:[#allocation7_spill]] }
 0x35f   : > { %p16_p0 = scmp.ge.s32.totalorder %s19_s28, 18   ;;  %s1106_s26 = sld [smem:[#allocation13_spill]] }
 0x360   : > { %s1107_s24 = sld [smem:[#allocation8_spill]]  ;;  %s1111_s21 = smov %s849_s22 }
 0x361   : > { %s1108_s25 = sld [smem:[#allocation9_spill]] }
 0x362   : > { %s1109_s9 = sld [smem:[#allocation10_spill]] }
 0x363   : > { %s1110_s27 = sld [smem:[#allocation11_spill]] }
 0x364   : > { %s1112_s22 = smov %s1105_s23  ;;  %18 = sbr.rel (!%p16_p0) target bundleno = 5 (0x5), region = 99 }
 0x365   : > { %s1113_s23 = smov %s1106_s26 }
 0x368   : > { %s1114_s26 = smov %s1109_s9 }
 0x369   :  { %571 = vsyncpa [#allocation4], 1 }
 0x36a   :  { %573 = vsyncpa [#allocation4 + $0x1], 1 }

</bundles_post_ra>
